<compile_context>
chip_gen: v5e
topology: v5e:2x2
jax: 0.10.0
libtpu: 0.0.40
codegen_flags: <defaults>
</compile_context>

<pallas_src>
import jax
import jax.numpy as jnp
from jax.experimental import pallas as pl
from jax.experimental.pallas import tpu as pltpu


def _add_pos_kernel(x_ref, pos_ref, o_ref):
    # x_ref: (B, tile)  pos_ref: (1, tile)  o_ref: (B, tile)
    # Broadcast add over the sublane (batch) axis.
    o_ref[...] = x_ref[...] + pos_ref[...]


def learnable_positional_encoding(x, pos_embedding, *, vmem_budget_bytes=24 << 20):
    """x: (B, T, D), pos_embedding: (1, T, D) -> (B, T, D)."""
    B, T, D = x.shape
    assert pos_embedding.shape == (1, T, D)

    pos = pos_embedding.astype(x.dtype)
    TD = T * D
    x2 = x.reshape(B, TD)
    p2 = pos.reshape(1, TD)

    itemsize = jnp.dtype(x.dtype).itemsize
    # Pipelined VMEM per lane-column of a tile:
    #   x block (B rows, double-buffered) + out block (B rows, x2) + pos block (1 row, x2)
    bytes_per_col = (2 * B + 2 * B + 2 * 1) * itemsize
    max_tile = max(128, vmem_budget_bytes // bytes_per_col)

    if TD <= max_tile:
        # Whole feature extent in one lane-dense block (allowed: equals full dim).
        tile = TD
    else:
        # Large fixed-size tile, multiple of 128 lanes (unmasked vst path).
        tile = max((max_tile // 128) * 128, 128)

    num_tiles = pl.cdiv(TD, tile)

    out2 = pl.pallas_call(
        _add_pos_kernel,
        out_shape=jax.ShapeDtypeStruct((B, TD), x.dtype),
        grid_spec=pltpu.PrefetchScalarGridSpec(
            num_scalar_prefetch=0,
            grid=(num_tiles,),
            in_specs=[
                pl.BlockSpec((B, tile), lambda i: (0, i)),   # x tile
                pl.BlockSpec((1, tile), lambda i: (0, i)),   # pos tile (fetched once per tile)
            ],
            out_specs=pl.BlockSpec((B, tile), lambda i: (0, i)),
        ),
        compiler_params=pltpu.CompilerParams(
            dimension_semantics=("parallel",),          # lets v7x shard tiles across its 2 TCs
            vmem_limit_bytes=48 * 1024 * 1024,           # > default scoped limit, < v7x physical
        ),
    )(x2, p2)

    return out2.reshape(B, T, D)


def init_pos_embedding(key, num_tokens, embedding_dim, std=0.02, dtype=jnp.float32):
    # Matches nn.init.trunc_normal_(tensor, std=0.02): truncation at +/-2
    # absolute (i.e. ~100 sigma), so effectively N(0, 0.02^2).
    vals = jax.random.truncated_normal(
        key, lower=-2.0 / std, upper=2.0 / std, shape=(1, num_tokens, embedding_dim)
    ) * std
    return vals.astype(dtype)


if __name__ == "__main__":
    # Small deterministic example consistent with the module's forward:
    # batch=2, num_tokens=3 (module default), embedding_dim=128.
    B, T, D = 2, 3, 128
    key = jax.random.PRNGKey(0)
    kx, kp = jax.random.split(key)

    x = jax.random.normal(kx, (B, T, D), dtype=jnp.float32)
    pos = init_pos_embedding(kp, T, D)

    out = learnable_positional_encoding(x, pos)
    out = jax.block_until_ready(out)

    # Reference check in plain JAX (broadcast add).
    ref = x + pos
    assert out.shape == (B, T, D)
    assert jnp.allclose(out, ref, atol=1e-6, rtol=1e-6)

    print("KERNEL_OK")
</pallas_src>

<mosaic_0001>
module attributes {stable_mosaic.version = 11 : i64} {
  func.func @_add_pos_kernel(%arg0: i32, %arg1: memref<2x384xf32, #tpu.memory_space<vmem>>, %arg2: memref<1x384xf32, #tpu.memory_space<vmem>>, %arg3: memref<2x384xf32, #tpu.memory_space<vmem>>) attributes {dimension_semantics = [#tpu.dimension_semantics<parallel>], iteration_bounds = array<i64: 1>, scalar_prefetch = 0 : i64, scratch_operands = 0 : i64, tpu.core_type = #tpu.core_type<tc>, window_params = [{transform_indices = @transform_0, window_bounds = array<i64: 2, 384>}, {transform_indices = @transform_1, window_bounds = array<i64: 1, 384>}, {transform_indices = @transform_2, window_bounds = array<i64: 2, 384>}]} {
    %c0 = arith.constant 0 : index
    %c0_0 = arith.constant 0 : index
    %0 = vector.load %arg1[%c0, %c0_0] : memref<2x384xf32, #tpu.memory_space<vmem>>, vector<2x384xf32>
    %c0_1 = arith.constant 0 : index
    %c0_2 = arith.constant 0 : index
    %1 = vector.load %arg2[%c0_1, %c0_2] : memref<1x384xf32, #tpu.memory_space<vmem>>, vector<1x384xf32>
    %2 = vector.broadcast %1 : vector<1x384xf32> to vector<2x384xf32>
    %3 = arith.addf %0, %2 : vector<2x384xf32>
    %c0_3 = arith.constant 0 : index
    %c0_4 = arith.constant 0 : index
    %4 = vector.load %arg3[%c0_3, %c0_4] : memref<2x384xf32, #tpu.memory_space<vmem>>, vector<2x384xf32>
    tpu.vector_store %arg3[%c0_3, %c0_4], %3 {strides = array<i32>} : memref<2x384xf32, #tpu.memory_space<vmem>>, vector<2x384xf32>,
    return
  }
  func.func @transform_0(%arg0: i32) -> (i32, i32) {
    %c0_i32 = arith.constant 0 : i32
    %c0_i32_0 = arith.constant 0 : i32
    return %c0_i32, %arg0 : i32, i32
  }
  func.func @transform_1(%arg0: i32) -> (i32, i32) {
    %c0_i32 = arith.constant 0 : i32
    %c0_i32_0 = arith.constant 0 : i32
    return %c0_i32, %arg0 : i32, i32
  }
  func.func @transform_2(%arg0: i32) -> (i32, i32) {
    %c0_i32 = arith.constant 0 : i32
    %c0_i32_0 = arith.constant 0 : i32
    return %c0_i32, %arg0 : i32, i32
  }
}

</mosaic_0001>

<bundles_post_ra>
// kernel: tpu_custom_call.1
= control target key start
LH: loop header
LB: loop body
LE: loop exit
PB: predicated region body
PF: predicated region fallthrough
CT: control target
= control target key end

     0   :  { %7 = vsyncpa [#allocation3], 0  ;;  %s181_s0 = inlined_call_operand.hbm [shape: f32[2,384], index: 0, kind: input, shape index: {}]   ;;  %s182_s1 = inlined_call_operand.hbm [shape: f32[1,384], index: 1, kind: input, shape index: {}]   ;;  %s183_s2 = inlined_call_operand.hbm [shape: f32[2,384], index: 2, kind: output, shape index: {}]  }
   0x1   :  { %8 = vsyncpa [#allocation6], 0 }
   0x2   :  { %9 = vsyncpa [#allocation4], 0  ;;  %s15_s11 = sshll.u32 %s181_s0, 4  ;;  %s154_s12 = smov [#allocation2]   ;;  %s16_s11 = int_to_ptr.hbm [resolvable:$true] %s15_s11 }
   0x3   :  { %s17_s13 = sshll.u32 %s154_s12, 4  ;;  %s26_s16 = sshll.u32 %s182_s1, 4  ;;  %s18_s13 = int_to_ptr.vmem [resolvable:$true] %s17_s13  ;;  %s27_s16 = int_to_ptr.hbm [resolvable:$true] %s26_s16 }
   0x4   :  { %20 = dma.hbm_to_vmem [thread:$0]  %s16_s11, 96, %s18_s13, [#allocation3]  }
   0x5   :  { %s155_s17 = smov [#allocation5]  }
   0x6   :  { %s28_s18 = sshll.u32 %s155_s17, 4  ;;  %s29_s18 = int_to_ptr.vmem [resolvable:$true] %s28_s18 }
   0x7   :  { %31 = dma.hbm_to_vmem [thread:$0]  %s27_s16, 48, %s29_s18, [#allocation6]  }
   0x8   :  { %148 = dma.done.wait [#allocation3], 96  }
   0x9   :  { %149 = vsyncadd [#allocation3], 4294967200 }
   0xa   :  { %150 = dma.done.wait [#allocation6], 48  }
   0xb   :  { %151 = vsyncadd [#allocation6], 4294967248  ;;  %v41_v0 = vld [vmem:[#allocation5] sm:$0x7]  ;;  %vm48_vm0 = vcmask 1041408   ;;  %vm50_vm1 = vcmask 1043456  }
   0xc   :  { %v43_v1 = vperm.slane %v41_v0, 0  ;;  %v44_v2 = vperm.slane %v41_v0, 1  ;;  %v45_v3 = vperm.slane %v41_v0, 2  ;;  %v40_v6 = vld [vmem:[#allocation2] sm:$0x3f]  ;;  %s156_s0 = smov [#allocation7]  }
   0xd   :  { %s60_s1 = sshll.u32 %s156_s0, 4  ;;  %s62_s21 = sshll.u32 %s183_s2, 4  ;;  %s61_s1 = int_to_ptr.vmem [resolvable:$true] %s60_s1  ;;  %s63_s21 = int_to_ptr.hbm [resolvable:$true] %s62_s21 }
   0xe   :  { %v46_v4 = vrot.slane %v44_v2, 6  ;;  %v47_v5 = vrot.slane %v45_v3, 4 }
  0x10   :  { %v49_v7 = vsel %vm48_vm0, %v43_v1, %v46_v4 }
  0x11   :  { %v51_v8 = vsel %vm50_vm1, %v49_v7, %v47_v5 }
  0x12   :  { %v53_v9 = vadd.f32 %v51_v8, %v40_v6 }
  0x14   :  { %54 = vst [vmem:[#allocation7] sm:$0x3f] %v53_v9 }
  0x15   :  { %65 = dma.vmem_to_hbm [thread:$0]  %s61_s1, 96, %s63_s21, [#allocation4]  }
  0x16   :  { %152 = dma.done.wait [#allocation4], 96  }
  0x17   :  { %153 = vsyncadd [#allocation4], 4294967200 }
  0x18   :  { %70 = vsyncpa [#allocation3], 1 }
  0x19   :  { %71 = vsyncpa [#allocation6], 1 }
  0x1a   :  { %72 = vsyncpa [#allocation4], 1 }

</bundles_post_ra>
